<compile_context>
chip_gen: v6e
topology: v6e:2x2x1
jax: 0.10.0
libtpu: 0.0.40
codegen_flags: <defaults>
</compile_context>

<pallas_src>
import functools

import jax
import jax.numpy as jnp
import numpy as np
from jax.experimental import pallas as pl
from jax.experimental.pallas import tpu as pltpu

LN_EPS = 1e-5
BN_EPS = 1e-5
_BF16 = jnp.bfloat16
_MM_PREC = jax.lax.Precision.DEFAULT        # bf16 x bf16 -> f32 MXU path

_PARALLEL = pltpu.CompilerParams(dimension_semantics=("parallel",),
                                 vmem_limit_bytes=48 * 1024 * 1024)
_WHOLE = pltpu.CompilerParams(dimension_semantics=("arbitrary",),
                              vmem_limit_bytes=48 * 1024 * 1024)


# ----------------------------------------------------------------------------
# Kernels
# ----------------------------------------------------------------------------
def _mlp_head_kernel(x_ref, *refs):
    """Fused: Linear(in,hid) -> 3x(ResBlock + Tanh) -> Linear(hid, 1024)."""
    *prm, o_ref = refs
    w0, b0 = prm[0], prm[1]
    h = jnp.dot(x_ref[...].astype(_BF16), w0[...],
                preferred_element_type=jnp.float32, precision=_MM_PREC) + b0[...]
    idx = 2
    for _ in range(3):
        w1, b1, w2, b2 = prm[idx:idx + 4]
        idx += 4
        t = jnp.tanh(jnp.dot(h.astype(_BF16), w1[...],
                             preferred_element_type=jnp.float32,
                             precision=_MM_PREC) + b1[...])
        t = jnp.tanh(jnp.dot(t.astype(_BF16), w2[...],
                             preferred_element_type=jnp.float32,
                             precision=_MM_PREC) + b2[...]) + h       # identity skip
        h = jnp.tanh(t)                                               # Sequential Tanh
    w_mid, b_mid = prm[idx], prm[idx + 1]
    o_ref[...] = jnp.dot(h.astype(_BF16), w_mid[...],
                         preferred_element_type=jnp.float32,
                         precision=_MM_PREC) + b_mid[...]


def _attn_trf_stack_kernel(x_ref, *refs, n_layers):
    """Fused 3x(Better_Attention + Better_Transformer) on the (B, P, D) view."""
    *prm, o_ref = refs
    x = x_ref[...]                                       # (B, P, D) float32
    for l in range(n_layers):
        (lng, lnb, wq, bq, wk, bk, wv, bv,
         bng, bnb, wt, btf) = prm[12 * l: 12 * (l + 1)]
        # ---- Better_Attention: LN(1024) -> Q/K/V -> softmax(dim=1) -> AV + x
        mu = jnp.mean(x, axis=(1, 2), keepdims=True)
        var = jnp.mean((x - mu) ** 2, axis=(1, 2), keepdims=True)
        xn = (x - mu) * jax.lax.rsqrt(var + LN_EPS)
        xn = xn * lng[...] + lnb[...]
        q = jnp.einsum("bpd,de->bpe", xn, wq[...].astype(jnp.float32),
                       preferred_element_type=jnp.float32) + bq[...]  # WQ pre-scaled
        k = jnp.einsum("bpd,de->bpe", xn, wk[...].astype(jnp.float32),
                       preferred_element_type=jnp.float32) + bk[...]
        v = jnp.einsum("bpd,de->bpe", xn, wv[...].astype(jnp.float32),
                       preferred_element_type=jnp.float32) + bv[...]
        dot = jnp.einsum("bpe,bqe->bpq", q, k, preferred_element_type=jnp.float32)
        # torch nn.Softmax(dim=1): softmax over the *first* partition axis
        m = jnp.max(dot, axis=1, keepdims=True)
        e = jnp.exp(dot - m)
        attn = e * pl.reciprocal(jnp.sum(e, axis=1, keepdims=True), approx=True)
        x = x + jnp.einsum("bpq,bqd->bpd", attn, v,
                           preferred_element_type=jnp.float32)
        # ---- Better_Transformer: BatchNorm1d (training-mode batch stats) ->
        #      block-diagonal (per-partition) matmul + bias -> tanh -> residual
        mu_b = jnp.mean(x, axis=0, keepdims=True)
        var_b = jnp.mean((x - mu_b) ** 2, axis=0, keepdims=True)
        xbn = (x - mu_b) * jax.lax.rsqrt(var_b + BN_EPS)
        xbn = xbn * bng[...] + bnb[...]
        o = jnp.einsum("bpd,pde->bpe", xbn, wt[...].astype(jnp.float32),
                       preferred_element_type=jnp.float32) + btf[...]
        x = jnp.tanh(o) + x
    o_ref[...] = x


def _out_linear_kernel(x_ref, w_ref, b_ref, o_ref):
    """Final Linear(1024, out) with the trailing Affine folded into W/b."""
    o_ref[...] = jnp.dot(x_ref[...].astype(_BF16), w_ref[...],
                         preferred_element_type=jnp.float32,
                         precision=_MM_PREC) + b_ref[...]


# ----------------------------------------------------------------------------
# Spec helpers
# ----------------------------------------------------------------------------
def _rep_spec(a):
    """Full-array block, constant index -> loaded once and kept VMEM-resident."""
    zeros = (0,) * a.ndim
    return pl.BlockSpec(a.shape, lambda i: zeros)


def _batch_tile(batch):
    for t in (512, 256, 128):
        if batch % t == 0:
            return t
    return batch


# ----------------------------------------------------------------------------
# Parameter preprocessing: fold Affines / softmax scale, cast weights to bf16
# ----------------------------------------------------------------------------
def preprocess_params(p, *, n_partitions=32):
    pp = {}
    pp["w0"] = p["w0"].astype(_BF16)
    pp["b0"] = p["b0"].reshape(1, -1)
    for i in range(3):
        rb = p[f"rb{i}"]
        g1, a1 = rb["g1"][0, 0], rb["a1"][0, 0]
        g2, a2 = rb["g2"][0, 0], rb["a2"][0, 0]
        # (x*g + a) @ W + b  ==  x @ (g*W) + (b + a*colsum(W))
        w1 = (rb["w1"] * g1).astype(_BF16)
        b1 = (rb["b1"] + a1 * jnp.sum(rb["w1"], axis=0)).reshape(1, -1)
        w2 = (rb["w2"] * g2).astype(_BF16)
        b2 = (rb["b2"] + a2 * jnp.sum(rb["w2"], axis=0)).reshape(1, -1)
        pp[f"rb{i}"] = (w1, b1, w2, b2)
    pp["w_mid"] = p["w_mid"].astype(_BF16)
    pp["b_mid"] = p["b_mid"].reshape(1, -1)

    F = p["w_mid"].shape[1]
    D = F // n_partitions
    inv_scale = 1.0 / float(np.sqrt(D))
    for i in range(3):
        a = p[f"attn{i}"]
        pp[f"attn{i}"] = dict(
            lng=a["lng"].reshape(1, n_partitions, D),
            lnb=a["lnb"].reshape(1, n_partitions, D),
            wq=(a["wq"] * inv_scale).astype(_BF16),          # fold 1/sqrt(D)
            bq=(a["bq"] * inv_scale).reshape(1, 1, D),
            wk=a["wk"].astype(_BF16), bk=a["bk"].reshape(1, 1, D),
            wv=a["wv"].astype(_BF16), bv=a["bv"].reshape(1, 1, D),
        )
        t = p[f"trf{i}"]
        pp[f"trf{i}"] = dict(
            bng=t["bng"].reshape(1, n_partitions, D),
            bnb=t["bnb"].reshape(1, n_partitions, D),
            w=t["w"].astype(_BF16),
            bias=t["bias"].reshape(1, n_partitions, D),
        )
    gain, ab = p["gain"][0, 0], p["abias"][0, 0]
    # (h @ W + b) * gain + abias  ==  h @ (gain*W) + (gain*b + abias)
    pp["wout"] = (p["wout"] * gain).astype(_BF16)
    pp["bout"] = (p["bout"] * gain + ab).reshape(1, -1)
    return pp


# ----------------------------------------------------------------------------
# Pallas forward
# ----------------------------------------------------------------------------
def trf_pallas(x, pp, *, n_partitions=32):
    B = x.shape[0]
    F = pp["w_mid"].shape[1]
    D = F // n_partitions
    bt = _batch_tile(B)
    grid = (B // bt,)

    # ---- stage 1: fused MLP head (batch-tiled, lane-dense 2D) ---------------
    args1 = [x, pp["w0"], pp["b0"]]
    for i in range(3):
        args1.extend(pp[f"rb{i}"])
    args1 += [pp["w_mid"], pp["b_mid"]]
    h = pl.pallas_call(
        _mlp_head_kernel,
        grid=grid,
        in_specs=[pl.BlockSpec((bt, x.shape[1]), lambda i: (i, 0))]
                 + [_rep_spec(a) for a in args1[1:]],
        out_specs=pl.BlockSpec((bt, F), lambda i: (i, 0)),
        out_shape=jax.ShapeDtypeStruct((B, F), jnp.float32),
        compiler_params=_PARALLEL,
    )(*args1)

    # ---- stage 2: fused 3x(attention + transformer), whole batch ------------
    # (whole-batch because BatchNorm1d uses training-mode batch statistics)
    h3 = h.reshape(B, n_partitions, D)
    args2 = [h3]
    for i in range(3):
        a = pp[f"attn{i}"]
        t = pp[f"trf{i}"]
        args2 += [a["lng"], a["lnb"], a["wq"], a["bq"], a["wk"], a["bk"],
                  a["wv"], a["bv"], t["bng"], t["bnb"], t["w"], t["bias"]]
    h3 = pl.pallas_call(
        functools.partial(_attn_trf_stack_kernel, n_layers=3),
        grid=(1,),
        in_specs=[_rep_spec(a) for a in args2],
        out_specs=pl.BlockSpec((B, n_partitions, D), lambda i: (0, 0, 0)),
        out_shape=jax.ShapeDtypeStruct((B, n_partitions, D), jnp.float32),
        compiler_params=_WHOLE,
    )(*args2)
    h = h3.reshape(B, F)

    # ---- stage 3: output linear with folded Affine (batch-tiled) ------------
    out_dim = pp["wout"].shape[1]
    out = pl.pallas_call(
        _out_linear_kernel,
        grid=grid,
        in_specs=[pl.BlockSpec((bt, F), lambda i: (i, 0)),
                  _rep_spec(pp["wout"]), _rep_spec(pp["bout"])],
        out_specs=pl.BlockSpec((bt, out_dim), lambda i: (i, 0)),
        out_shape=jax.ShapeDtypeStruct((B, out_dim), jnp.float32),
        compiler_params=_PARALLEL,
    )(h, pp["wout"], pp["bout"])
    return out


# ----------------------------------------------------------------------------
# Pure-JAX mirror of exactly the kernel math (same folded / bf16 weights):
# used for a tight correctness check of the Pallas implementation.
# ----------------------------------------------------------------------------
def trf_reference_folded(x, pp, *, n_partitions=32):
    def mm(a, w):
        return jnp.dot(a.astype(_BF16), w, preferred_element_type=jnp.float32,
                       precision=_MM_PREC)

    h = mm(x, pp["w0"]) + pp["b0"]
    for i in range(3):
        w1, b1, w2, b2 = pp[f"rb{i}"]
        t = jnp.tanh(mm(h, w1) + b1)
        t = jnp.tanh(mm(t, w2) + b2) + h
        h = jnp.tanh(t)
    h = mm(h, pp["w_mid"]) + pp["b_mid"]

    B, F = h.shape
    D = F // n_partitions
    x3 = h.reshape(B, n_partitions, D)
    for i in range(3):
        a = pp[f"attn{i}"]
        t = pp[f"trf{i}"]
        mu = jnp.mean(x3, axis=(1, 2), keepdims=True)
        var = jnp.mean((x3 - mu) ** 2, axis=(1, 2), keepdims=True)
        xn = (x3 - mu) * jax.lax.rsqrt(var + LN_EPS)
        xn = xn * a["lng"] + a["lnb"]
        q = jnp.einsum("bpd,de->bpe", xn, a["wq"].astype(jnp.float32),
                       preferred_element_type=jnp.float32) + a["bq"]
        k = jnp.einsum("bpd,de->bpe", xn, a["wk"].astype(jnp.float32),
                       preferred_element_type=jnp.float32) + a["bk"]
        v = jnp.einsum("bpd,de->bpe", xn, a["wv"].astype(jnp.float32),
                       preferred_element_type=jnp.float32) + a["bv"]
        dot = jnp.einsum("bpe,bqe->bpq", q, k, preferred_element_type=jnp.float32)
        m = jnp.max(dot, axis=1, keepdims=True)
        e = jnp.exp(dot - m)
        attn = e / jnp.sum(e, axis=1, keepdims=True)
        x3 = x3 + jnp.einsum("bpq,bqd->bpd", attn, v,
                             preferred_element_type=jnp.float32)
        mu_b = jnp.mean(x3, axis=0, keepdims=True)
        var_b = jnp.mean((x3 - mu_b) ** 2, axis=0, keepdims=True)
        xbn = (x3 - mu_b) * jax.lax.rsqrt(var_b + BN_EPS)
        xbn = xbn * t["bng"] + t["bnb"]
        o = jnp.einsum("bpd,pde->bpe", xbn, t["w"].astype(jnp.float32),
                       preferred_element_type=jnp.float32) + t["bias"]
        x3 = jnp.tanh(o) + x3
    h = x3.reshape(B, F)
    return mm(h, pp["wout"]) + pp["bout"]


# ----------------------------------------------------------------------------
# Pure-JAX f32 reference that mirrors the torch forward exactly (no folding,
# no bf16) -- used as a gross semantic sanity check.
# ----------------------------------------------------------------------------
def trf_reference_f32(x, p, *, n_partitions=32):
    h = x @ p["w0"] + p["b0"]
    for i in range(3):
        rb = p[f"rb{i}"]
        s = h
        t = jnp.tanh((h * rb["g1"][0, 0] + rb["a1"][0, 0]) @ rb["w1"] + rb["b1"])
        t = jnp.tanh((t * rb["g2"][0, 0] + rb["a2"][0, 0]) @ rb["w2"] + rb["b2"]) + s
        h = jnp.tanh(t)
    h = h @ p["w_mid"] + p["b_mid"]
    B, F = h.shape
    D = F // n_partitions
    scale = np.sqrt(D)
    for i in range(3):
        a = p[f"attn{i}"]
        mu = h.mean(-1, keepdims=True)
        var = ((h - mu) ** 2).mean(-1, keepdims=True)
        xn = (h - mu) / jnp.sqrt(var + LN_EPS) * a["lng"] + a["lnb"]
        _x = xn.reshape(B, n_partitions, D)
        q = _x @ a["wq"] + a["bq"]
        k = _x @ a["wk"] + a["bk"]
        v = _x @ a["wv"] + a["bv"]
        dot = jnp.einsum("bpe,bqe->bpq", q, k) / scale
        attn = jax.nn.softmax(dot, axis=1)
        prod = jnp.einsum("bpq,bqd->bpd", attn, v)
        h = prod.reshape(B, -1) + h

        t = p[f"trf{i}"]
        mu = h.mean(0, keepdims=True)
        var = ((h - mu) ** 2).mean(0, keepdims=True)
        xn = (h - mu) / jnp.sqrt(var + BN_EPS) * t["bng"] + t["bnb"]
        xp = xn.reshape(B, n_partitions, D)
        o = jnp.einsum("bpd,pde->bpe", xp, t["w"]).reshape(B, -1) + t["bias"]
        h = jnp.tanh(o) + h
    h = h @ p["wout"] + p["bout"]
    h = h * p["gain"][0, 0] + p["abias"][0, 0]
    return h


# ----------------------------------------------------------------------------
# Deterministic parameter init (synthetic, PyTorch-default-style bounds)
# ----------------------------------------------------------------------------
def init_params(key, input_dim, output_dim, int_dim_arg, n_partitions=32,
                int_dim_trf=1024):
    hid = int_dim_arg * 128
    D = int_dim_trf // n_partitions
    keys = iter(jax.random.split(key, 64))

    def u(shape, fan_in):
        b = 1.0 / np.sqrt(fan_in)
        return jax.random.uniform(next(keys), shape, jnp.float32, -b, b)

    ones11 = jnp.ones((1, 1), jnp.float32)
    zeros11 = jnp.zeros((1, 1), jnp.float32)

    p = {"w0": u((input_dim, hid), input_dim), "b0": u((hid,), input_dim)}
    for i in range(3):
        p[f"rb{i}"] = dict(
            g1=ones11, a1=zeros11, g2=ones11, a2=zeros11,
            w1=u((hid, hid), hid), b1=u((hid,), hid),
            w2=u((hid, hid), hid), b2=u((hid,), hid),
        )
    p["w_mid"] = u((hid, int_dim_trf), hid)
    p["b_mid"] = u((int_dim_trf,), hid)
    for i in range(3):
        p[f"attn{i}"] = dict(
            lng=jnp.ones((int_dim_trf,), jnp.float32),
            lnb=jnp.zeros((int_dim_trf,), jnp.float32),
            wq=u((D, D), D), bq=u((D,), D),
            wk=u((D, D), D), bk=u((D,), D),
            wv=u((D, D), D), bv=u((D,), D),
        )
        p[f"trf{i}"] = dict(
            bng=jnp.ones((int_dim_trf,), jnp.float32),
            bnb=jnp.zeros((int_dim_trf,), jnp.float32),
            w=u((n_partitions, D, D), D * D),     # kaiming_uniform(a=sqrt(5)) bound
            bias=u((int_dim_trf,), D * D),
        )
    p["wout"] = u((int_dim_trf, output_dim), int_dim_trf)
    p["bout"] = u((output_dim,), int_dim_trf)
    p["gain"] = ones11
    p["abias"] = zeros11
    return p


# ----------------------------------------------------------------------------
if __name__ == "__main__":
    B, INPUT_DIM, OUTPUT_DIM, INT_DIM_ARG = 8, 8, 16, 1   # hid = int_dim*128 = 128

    key = jax.random.PRNGKey(0)
    kp, kx = jax.random.split(key)
    params = init_params(kp, INPUT_DIM, OUTPUT_DIM, INT_DIM_ARG)
    x = jax.random.normal(kx, (B, INPUT_DIM), jnp.float32)
    pp = preprocess_params(params)

    with jax.default_matmul_precision("highest"):
        out = jax.block_until_ready(trf_pallas(x, pp))
        ref_folded = jax.block_until_ready(trf_reference_folded(x, pp))
        ref_f32 = jax.block_until_ready(trf_reference_f32(x, params))

    assert out.shape == (B, OUTPUT_DIM)
    # Tight check against the exact (folded / bf16-weight) math the kernels run.
    np.testing.assert_allclose(np.asarray(out), np.asarray(ref_folded),
                               rtol=5e-3, atol=5e-3)
    # Gross semantic sanity vs the unquantized f32 torch-faithful reference
    # (residual difference is bf16 weight quantization only).
    assert float(jnp.max(jnp.abs(out - ref_f32))) < 0.1
    print("KERNEL_OK")
</pallas_src>

<mosaic_0001>
module attributes {stable_mosaic.version = 11 : i64} {
  func.func @_mlp_head_kernel(%arg0: i32, %arg1: memref<8x8xf32, #tpu.memory_space<vmem>>, %arg2: memref<8x128xbf16, #tpu.memory_space<vmem>>, %arg3: memref<1x128xf32, #tpu.memory_space<vmem>>, %arg4: memref<128x128xbf16, #tpu.memory_space<vmem>>, %arg5: memref<1x128xf32, #tpu.memory_space<vmem>>, %arg6: memref<128x128xbf16, #tpu.memory_space<vmem>>, %arg7: memref<1x128xf32, #tpu.memory_space<vmem>>, %arg8: memref<128x128xbf16, #tpu.memory_space<vmem>>, %arg9: memref<1x128xf32, #tpu.memory_space<vmem>>, %arg10: memref<128x128xbf16, #tpu.memory_space<vmem>>, %arg11: memref<1x128xf32, #tpu.memory_space<vmem>>, %arg12: memref<128x128xbf16, #tpu.memory_space<vmem>>, %arg13: memref<1x128xf32, #tpu.memory_space<vmem>>, %arg14: memref<128x128xbf16, #tpu.memory_space<vmem>>, %arg15: memref<1x128xf32, #tpu.memory_space<vmem>>, %arg16: memref<128x1024xbf16, #tpu.memory_space<vmem>>, %arg17: memref<1x1024xf32, #tpu.memory_space<vmem>>, %arg18: memref<8x1024xf32, #tpu.memory_space<vmem>>) attributes {dimension_semantics = [#tpu.dimension_semantics<parallel>], iteration_bounds = array<i64: 1>, scalar_prefetch = 0 : i64, scratch_operands = 0 : i64, tpu.core_type = #tpu.core_type<tc>, window_params = [{transform_indices = @transform_0, window_bounds = array<i64: 8, 8>}, {pipeline_mode = #tpu.pipeline_mode<synchronous>, transform_indices = @transform_1, window_bounds = array<i64: 8, 128>}, {pipeline_mode = #tpu.pipeline_mode<synchronous>, transform_indices = @transform_2, window_bounds = array<i64: 1, 128>}, {pipeline_mode = #tpu.pipeline_mode<synchronous>, transform_indices = @transform_3, window_bounds = array<i64: 128, 128>}, {pipeline_mode = #tpu.pipeline_mode<synchronous>, transform_indices = @transform_4, window_bounds = array<i64: 1, 128>}, {pipeline_mode = #tpu.pipeline_mode<synchronous>, transform_indices = @transform_5, window_bounds = array<i64: 128, 128>}, {pipeline_mode = #tpu.pipeline_mode<synchronous>, transform_indices = @transform_6, window_bounds = array<i64: 1, 128>}, {pipeline_mode = #tpu.pipeline_mode<synchronous>, transform_indices = @transform_7, window_bounds = array<i64: 128, 128>}, {pipeline_mode = #tpu.pipeline_mode<synchronous>, transform_indices = @transform_8, window_bounds = array<i64: 1, 128>}, {pipeline_mode = #tpu.pipeline_mode<synchronous>, transform_indices = @transform_9, window_bounds = array<i64: 128, 128>}, {pipeline_mode = #tpu.pipeline_mode<synchronous>, transform_indices = @transform_10, window_bounds = array<i64: 1, 128>}, {pipeline_mode = #tpu.pipeline_mode<synchronous>, transform_indices = @transform_11, window_bounds = array<i64: 128, 128>}, {pipeline_mode = #tpu.pipeline_mode<synchronous>, transform_indices = @transform_12, window_bounds = array<i64: 1, 128>}, {pipeline_mode = #tpu.pipeline_mode<synchronous>, transform_indices = @transform_13, window_bounds = array<i64: 128, 128>}, {pipeline_mode = #tpu.pipeline_mode<synchronous>, transform_indices = @transform_14, window_bounds = array<i64: 1, 128>}, {pipeline_mode = #tpu.pipeline_mode<synchronous>, transform_indices = @transform_15, window_bounds = array<i64: 128, 1024>}, {pipeline_mode = #tpu.pipeline_mode<synchronous>, transform_indices = @transform_16, window_bounds = array<i64: 1, 1024>}, {transform_indices = @transform_17, window_bounds = array<i64: 8, 1024>}]} {
    %c0 = arith.constant 0 : index
    %c0_0 = arith.constant 0 : index
    %0 = vector.load %arg1[%c0, %c0_0] : memref<8x8xf32, #tpu.memory_space<vmem>>, vector<8x8xf32>
    %1 = arith.truncf %0 : vector<8x8xf32> to vector<8x8xbf16>
    %c0_1 = arith.constant 0 : index
    %c0_2 = arith.constant 0 : index
    %2 = vector.load %arg2[%c0_1, %c0_2] : memref<8x128xbf16, #tpu.memory_space<vmem>>, vector<8x128xbf16>
    %cst = arith.constant dense<0.000000e+00> : vector<8x128xf32>
    %3 = tpu.matmul %1, %2, %cst {dimension_numbers = #tpu.dot_dimension_numbers<[1], [0], [0], [1], [0, 0, 1, 1], [], []>} : vector<8x8xbf16>, vector<8x128xbf16>, vector<8x128xf32> -> vector<8x128xf32>
    %c0_3 = arith.constant 0 : index
    %c0_4 = arith.constant 0 : index
    %4 = vector.load %arg3[%c0_3, %c0_4] : memref<1x128xf32, #tpu.memory_space<vmem>>, vector<1x128xf32>
    %5 = vector.broadcast %4 : vector<1x128xf32> to vector<8x128xf32>
    %6 = arith.addf %3, %5 : vector<8x128xf32>
    %7 = arith.truncf %6 : vector<8x128xf32> to vector<8x128xbf16>
    %c0_5 = arith.constant 0 : index
    %c0_6 = arith.constant 0 : index
    %8 = vector.load %arg4[%c0_5, %c0_6] : memref<128x128xbf16, #tpu.memory_space<vmem>>, vector<128x128xbf16>
    %cst_7 = arith.constant dense<0.000000e+00> : vector<8x128xf32>
    %9 = tpu.matmul %7, %8, %cst_7 {dimension_numbers = #tpu.dot_dimension_numbers<[1], [0], [0], [1], [0, 0, 1, 1], [], []>} : vector<8x128xbf16>, vector<128x128xbf16>, vector<8x128xf32> -> vector<8x128xf32>
    %c0_8 = arith.constant 0 : index
    %c0_9 = arith.constant 0 : index
    %10 = vector.load %arg5[%c0_8, %c0_9] : memref<1x128xf32, #tpu.memory_space<vmem>>, vector<1x128xf32>
    %11 = vector.broadcast %10 : vector<1x128xf32> to vector<8x128xf32>
    %12 = arith.addf %9, %11 : vector<8x128xf32>
    %13 = math.tanh %12 : vector<8x128xf32>
    %14 = arith.truncf %13 : vector<8x128xf32> to vector<8x128xbf16>
    %c0_10 = arith.constant 0 : index
    %c0_11 = arith.constant 0 : index
    %15 = vector.load %arg6[%c0_10, %c0_11] : memref<128x128xbf16, #tpu.memory_space<vmem>>, vector<128x128xbf16>
    %cst_12 = arith.constant dense<0.000000e+00> : vector<8x128xf32>
    %16 = tpu.matmul %14, %15, %cst_12 {dimension_numbers = #tpu.dot_dimension_numbers<[1], [0], [0], [1], [0, 0, 1, 1], [], []>} : vector<8x128xbf16>, vector<128x128xbf16>, vector<8x128xf32> -> vector<8x128xf32>
    %c0_13 = arith.constant 0 : index
    %c0_14 = arith.constant 0 : index
    %17 = vector.load %arg7[%c0_13, %c0_14] : memref<1x128xf32, #tpu.memory_space<vmem>>, vector<1x128xf32>
    %18 = vector.broadcast %17 : vector<1x128xf32> to vector<8x128xf32>
    %19 = arith.addf %16, %18 : vector<8x128xf32>
    %20 = math.tanh %19 : vector<8x128xf32>
    %21 = arith.addf %20, %6 : vector<8x128xf32>
    %22 = math.tanh %21 : vector<8x128xf32>
    %23 = arith.truncf %22 : vector<8x128xf32> to vector<8x128xbf16>
    %c0_15 = arith.constant 0 : index
    %c0_16 = arith.constant 0 : index
    %24 = vector.load %arg8[%c0_15, %c0_16] : memref<128x128xbf16, #tpu.memory_space<vmem>>, vector<128x128xbf16>
    %cst_17 = arith.constant dense<0.000000e+00> : vector<8x128xf32>
    %25 = tpu.matmul %23, %24, %cst_17 {dimension_numbers = #tpu.dot_dimension_numbers<[1], [0], [0], [1], [0, 0, 1, 1], [], []>} : vector<8x128xbf16>, vector<128x128xbf16>, vector<8x128xf32> -> vector<8x128xf32>
    %c0_18 = arith.constant 0 : index
    %c0_19 = arith.constant 0 : index
    %26 = vector.load %arg9[%c0_18, %c0_19] : memref<1x128xf32, #tpu.memory_space<vmem>>, vector<1x128xf32>
    %27 = vector.broadcast %26 : vector<1x128xf32> to vector<8x128xf32>
    %28 = arith.addf %25, %27 : vector<8x128xf32>
    %29 = math.tanh %28 : vector<8x128xf32>
    %30 = arith.truncf %29 : vector<8x128xf32> to vector<8x128xbf16>
    %c0_20 = arith.constant 0 : index
    %c0_21 = arith.constant 0 : index
    %31 = vector.load %arg10[%c0_20, %c0_21] : memref<128x128xbf16, #tpu.memory_space<vmem>>, vector<128x128xbf16>
    %cst_22 = arith.constant dense<0.000000e+00> : vector<8x128xf32>
    %32 = tpu.matmul %30, %31, %cst_22 {dimension_numbers = #tpu.dot_dimension_numbers<[1], [0], [0], [1], [0, 0, 1, 1], [], []>} : vector<8x128xbf16>, vector<128x128xbf16>, vector<8x128xf32> -> vector<8x128xf32>
    %c0_23 = arith.constant 0 : index
    %c0_24 = arith.constant 0 : index
    %33 = vector.load %arg11[%c0_23, %c0_24] : memref<1x128xf32, #tpu.memory_space<vmem>>, vector<1x128xf32>
    %34 = vector.broadcast %33 : vector<1x128xf32> to vector<8x128xf32>
    %35 = arith.addf %32, %34 : vector<8x128xf32>
    %36 = math.tanh %35 : vector<8x128xf32>
    %37 = arith.addf %36, %22 : vector<8x128xf32>
    %38 = math.tanh %37 : vector<8x128xf32>
    %39 = arith.truncf %38 : vector<8x128xf32> to vector<8x128xbf16>
    %c0_25 = arith.constant 0 : index
    %c0_26 = arith.constant 0 : index
    %40 = vector.load %arg12[%c0_25, %c0_26] : memref<128x128xbf16, #tpu.memory_space<vmem>>, vector<128x128xbf16>
    %cst_27 = arith.constant dense<0.000000e+00> : vector<8x128xf32>
    %41 = tpu.matmul %39, %40, %cst_27 {dimension_numbers = #tpu.dot_dimension_numbers<[1], [0], [0], [1], [0, 0, 1, 1], [], []>} : vector<8x128xbf16>, vector<128x128xbf16>, vector<8x128xf32> -> vector<8x128xf32>
    %c0_28 = arith.constant 0 : index
    %c0_29 = arith.constant 0 : index
    %42 = vector.load %arg13[%c0_28, %c0_29] : memref<1x128xf32, #tpu.memory_space<vmem>>, vector<1x128xf32>
    %43 = vector.broadcast %42 : vector<1x128xf32> to vector<8x128xf32>
    %44 = arith.addf %41, %43 : vector<8x128xf32>
    %45 = math.tanh %44 : vector<8x128xf32>
    %46 = arith.truncf %45 : vector<8x128xf32> to vector<8x128xbf16>
    %c0_30 = arith.constant 0 : index
    %c0_31 = arith.constant 0 : index
    %47 = vector.load %arg14[%c0_30, %c0_31] : memref<128x128xbf16, #tpu.memory_space<vmem>>, vector<128x128xbf16>
    %cst_32 = arith.constant dense<0.000000e+00> : vector<8x128xf32>
    %48 = tpu.matmul %46, %47, %cst_32 {dimension_numbers = #tpu.dot_dimension_numbers<[1], [0], [0], [1], [0, 0, 1, 1], [], []>} : vector<8x128xbf16>, vector<128x128xbf16>, vector<8x128xf32> -> vector<8x128xf32>
    %c0_33 = arith.constant 0 : index
    %c0_34 = arith.constant 0 : index
    %49 = vector.load %arg15[%c0_33, %c0_34] : memref<1x128xf32, #tpu.memory_space<vmem>>, vector<1x128xf32>
    %50 = vector.broadcast %49 : vector<1x128xf32> to vector<8x128xf32>
    %51 = arith.addf %48, %50 : vector<8x128xf32>
    %52 = math.tanh %51 : vector<8x128xf32>
    %53 = arith.addf %52, %38 : vector<8x128xf32>
    %54 = math.tanh %53 : vector<8x128xf32>
    %55 = arith.truncf %54 : vector<8x128xf32> to vector<8x128xbf16>
    %c0_35 = arith.constant 0 : index
    %c0_36 = arith.constant 0 : index
    %56 = vector.load %arg16[%c0_35, %c0_36] : memref<128x1024xbf16, #tpu.memory_space<vmem>>, vector<128x1024xbf16>
    %cst_37 = arith.constant dense<0.000000e+00> : vector<8x1024xf32>
    %57 = tpu.matmul %55, %56, %cst_37 {dimension_numbers = #tpu.dot_dimension_numbers<[1], [0], [0], [1], [0, 0, 1, 1], [], []>} : vector<8x128xbf16>, vector<128x1024xbf16>, vector<8x1024xf32> -> vector<8x1024xf32>
    %c0_38 = arith.constant 0 : index
    %c0_39 = arith.constant 0 : index
    %58 = vector.load %arg17[%c0_38, %c0_39] : memref<1x1024xf32, #tpu.memory_space<vmem>>, vector<1x1024xf32>
    %59 = vector.broadcast %58 : vector<1x1024xf32> to vector<8x1024xf32>
    %60 = arith.addf %57, %59 : vector<8x1024xf32>
    %c0_40 = arith.constant 0 : index
    %c0_41 = arith.constant 0 : index
    %61 = vector.load %arg18[%c0_40, %c0_41] : memref<8x1024xf32, #tpu.memory_space<vmem>>, vector<8x1024xf32>
    tpu.vector_store %arg18[%c0_40, %c0_41], %60 {strides = array<i32>} : memref<8x1024xf32, #tpu.memory_space<vmem>>, vector<8x1024xf32>,
    return
  }
  func.func @transform_0(%arg0: i32) -> (i32, i32) {
    %c0_i32 = arith.constant 0 : i32
    %c0_i32_0 = arith.constant 0 : i32
    return %arg0, %c0_i32 : i32, i32
  }
  func.func @transform_1(%arg0: i32) -> (i32, i32) {
    %c0_i32 = arith.constant 0 : i32
    %c0_i32_0 = arith.constant 0 : i32
    %c0_i32_1 = arith.constant 0 : i32
    return %c0_i32, %c0_i32_0 : i32, i32
  }
  func.func @transform_2(%arg0: i32) -> (i32, i32) {
    %c0_i32 = arith.constant 0 : i32
    %c0_i32_0 = arith.constant 0 : i32
    %c0_i32_1 = arith.constant 0 : i32
    return %c0_i32, %c0_i32_0 : i32, i32
  }
  func.func @transform_3(%arg0: i32) -> (i32, i32) {
    %c0_i32 = arith.constant 0 : i32
    %c0_i32_0 = arith.constant 0 : i32
    %c0_i32_1 = arith.constant 0 : i32
    return %c0_i32, %c0_i32_0 : i32, i32
  }
  func.func @transform_4(%arg0: i32) -> (i32, i32) {
    %c0_i32 = arith.constant 0 : i32
    %c0_i32_0 = arith.constant 0 : i32
    %c0_i32_1 = arith.constant 0 : i32
    return %c0_i32, %c0_i32_0 : i32, i32
  }
  func.func @transform_5(%arg0: i32) -> (i32, i32) {
    %c0_i32 = arith.constant 0 : i32
    %c0_i32_0 = arith.constant 0 : i32
    %c0_i32_1 = arith.constant 0 : i32
    return %c0_i32, %c0_i32_0 : i32, i32
  }
  func.func @transform_6(%arg0: i32) -> (i32, i32) {
    %c0_i32 = arith.constant 0 : i32
    %c0_i32_0 = arith.constant 0 : i32
    %c0_i32_1 = arith.constant 0 : i32
    return %c0_i32, %c0_i32_0 : i32, i32
  }
  func.func @transform_7(%arg0: i32) -> (i32, i32) {
    %c0_i32 = arith.constant 0 : i32
    %c0_i32_0 = arith.constant 0 : i32
    %c0_i32_1 = arith.constant 0 : i32
    return %c0_i32, %c0_i32_0 : i32, i32
  }
  func.func @transform_8(%arg0: i32) -> (i32, i32) {
    %c0_i32 = arith.constant 0 : i32
    %c0_i32_0 = arith.constant 0 : i32
    %c0_i32_1 = arith.constant 0 : i32
    return %c0_i32, %c0_i32_0 : i32, i32
  }
  func.func @transform_9(%arg0: i32) -> (i32, i32) {
    %c0_i32 = arith.constant 0 : i32
    %c0_i32_0 = arith.constant 0 : i32
    %c0_i32_1 = arith.constant 0 : i32
    return %c0_i32, %c0_i32_0 : i32, i32
  }
  func.func @transform_10(%arg0: i32) -> (i32, i32) {
    %c0_i32 = arith.constant 0 : i32
    %c0_i32_0 = arith.constant 0 : i32
    %c0_i32_1 = arith.constant 0 : i32
    return %c0_i32, %c0_i32_0 : i32, i32
  }
  func.func @transform_11(%arg0: i32) -> (i32, i32) {
    %c0_i32 = arith.constant 0 : i32
    %c0_i32_0 = arith.constant 0 : i32
    %c0_i32_1 = arith.constant 0 : i32
    return %c0_i32, %c0_i32_0 : i32, i32
  }
  func.func @transform_12(%arg0: i32) -> (i32, i32) {
    %c0_i32 = arith.constant 0 : i32
    %c0_i32_0 = arith.constant 0 : i32
    %c0_i32_1 = arith.constant 0 : i32
    return %c0_i32, %c0_i32_0 : i32, i32
  }
  func.func @transform_13(%arg0: i32) -> (i32, i32) {
    %c0_i32 = arith.constant 0 : i32
    %c0_i32_0 = arith.constant 0 : i32
    %c0_i32_1 = arith.constant 0 : i32
    return %c0_i32, %c0_i32_0 : i32, i32
  }
  func.func @transform_14(%arg0: i32) -> (i32, i32) {
    %c0_i32 = arith.constant 0 : i32
    %c0_i32_0 = arith.constant 0 : i32
    %c0_i32_1 = arith.constant 0 : i32
    return %c0_i32, %c0_i32_0 : i32, i32
  }
  func.func @transform_15(%arg0: i32) -> (i32, i32) {
    %c0_i32 = arith.constant 0 : i32
    %c0_i32_0 = arith.constant 0 : i32
    %c0_i32_1 = arith.constant 0 : i32
    return %c0_i32, %c0_i32_0 : i32, i32
  }
  func.func @transform_16(%arg0: i32) -> (i32, i32) {
    %c0_i32 = arith.constant 0 : i32
    %c0_i32_0 = arith.constant 0 : i32
    %c0_i32_1 = arith.constant 0 : i32
    return %c0_i32, %c0_i32_0 : i32, i32
  }
  func.func @transform_17(%arg0: i32) -> (i32, i32) {
    %c0_i32 = arith.constant 0 : i32
    %c0_i32_0 = arith.constant 0 : i32
    return %arg0, %c0_i32 : i32, i32
  }
}

</mosaic_0001>

<bundles_post_ra>
// kernel: tpu_custom_call.1
= control target key start
LH: loop header
LB: loop body
LE: loop exit
PB: predicated region body
PF: predicated region fallthrough
CT: control target
= control target key end

     0   :  { %s2422_s0 = inlined_call_operand.hbm [shape: f32[8,8], index: 0, kind: input, shape index: {}]   ;;  %s2423_s1 = inlined_call_operand.hbm [shape: bf16[8,128], index: 1, kind: input, shape index: {}]   ;;  %s2424_s2 = inlined_call_operand.vmem [shape: f32[1,128], index: 2, kind: input, shape index: {}]   ;;  %s2425_s3 = inlined_call_operand.hbm [shape: bf16[128,128], index: 3, kind: input, shape index: {}]   ;;  %s2426_s4 = inlined_call_operand.vmem [shape: f32[1,128], index: 4, kind: input, shape index: {}]   ;;  %s2427_s5 = inlined_call_operand.hbm [shape: bf16[128,128], index: 5, kind: input, shape index: {}]   ;;  %s2428_s6 = inlined_call_operand.vmem [shape: f32[1,128], index: 6, kind: input, shape index: {}]   ;;  %s2429_s7 = inlined_call_operand.hbm [shape: bf16[128,128], index: 7, kind: input, shape index: {}]   ;;  %s2430_s8 = inlined_call_operand.vmem [shape: f32[1,128], index: 8, kind: input, shape index: {}]   ;;  %s2431_s9 = inlined_call_operand.hbm [shape: bf16[128,128], index: 9, kind: input, shape index: {}]   ;;  %s2432_s10 = inlined_call_operand.vmem [shape: f32[1,128], index: 10, kind: input, shape index: {}]   ;;  %s2433_s11 = inlined_call_operand.hbm [shape: bf16[128,128], index: 11, kind: input, shape index: {}]   ;;  %s2434_s12 = inlined_call_operand.vmem [shape: f32[1,128], index: 12, kind: input, shape index: {}]   ;;  %s2435_s13 = inlined_call_operand.hbm [shape: bf16[128,128], index: 13, kind: input, shape index: {}]   ;;  %s2436_s14 = inlined_call_operand.vmem [shape: f32[1,128], index: 14, kind: input, shape index: {}]   ;;  %s2437_s15 = inlined_call_operand.hbm [shape: bf16[128,1024], index: 15, kind: input, shape index: {}]   ;;  %s2438_s16 = inlined_call_operand.vmem [shape: f32[1,1024], index: 16, kind: input, shape index: {}]   ;;  %s2439_s17 = inlined_call_operand.hbm [shape: f32[8,1024], index: 17, kind: output, shape index: {}]  }
   0x1   :  { %2440 = sst [smem:[#allocation24_spill]] %s2422_s0 }
   0x2   :  { %2441 = sst [smem:[#allocation25_spill]] %s2423_s1 }
   0x3   :  { %22 = vsyncpa [#allocation3], 0 }
   0x4   :  { %23 = vsyncpa [#allocation6], 0 }
   0x5   :  { %24 = vsyncpa [#allocation9], 0 }
   0x6   :  { %25 = vsyncpa [#allocation12], 0 }
   0x7   :  { %26 = vsyncpa [#allocation15], 0 }
   0x8   :  { %27 = vsyncpa [#allocation4], 0  ;;  %s2133_s24 = smov [#allocation5]  }
   0x9   :  { %s44_s25 = sshll.u32 %s2133_s24, 4  ;;  %s45_s25 = int_to_ptr.vmem [resolvable:$true] %s44_s25 }
   0xa   :  { %s1929_s26 = scalar_lea.vmem %s45_s25, 64  ;;  %p1934_p1 = scmp.lt.s32.totalorder %s45_s25, %s45_s25 }
   0xb   :  { %p1930_p0 = scmp.ne.s32.totalorder %s45_s25, %s1929_s26  ;;  %p1935_p2 = scmp.lt.s32.totalorder %s1929_s26, %s1929_s26 }
   0xd   :  { %p1936_p3 = por %p1935_p2, %p1934_p1 }
   0xf   :  { %p1937_p4 = pnand %p1936_p3, %p1930_p0 }
  0x11   :  { %1940 = shalt.err (!%p1937_p4)
}
  0x12   :  { %s2442_s29 = sld [smem:[#allocation25_spill]]  ;;  %s2134_s0 = smov [#allocation8]  }
  0x13   :  { %s69_s30 = sshll.u32 %s2134_s0, 4  ;;  %s2135_s18 = smov [#allocation11]   ;;  %s70_s30 = int_to_ptr.vmem [resolvable:$true] %s69_s30 }
  0x14   :  { %s97_s19 = sshll.u32 %s2135_s18, 4  ;;  %s1949_s1 = scalar_lea.vmem %s70_s30, 1024  ;;  %s98_s19 = int_to_ptr.vmem [resolvable:$true] %s97_s19 }
  0x15   :  { %p1950_p5 = scmp.ne.s32.totalorder %s70_s30, %s1949_s1  ;;  %p1954_p6 = scmp.lt.s32.totalorder %s70_s30, %s70_s30 }
  0x16   :  { %p1955_p7 = scmp.lt.s32.totalorder %s1949_s1, %s1949_s1 }
  0x18   :  { %47 = dma.hbm_to_vmem [thread:$0]  %s2442_s29, 64, %s45_s25, [#allocation6]  }
  0x19   :  { %p1956_p8 = por %p1955_p7, %p1954_p6 }
  0x1b   :  { %p1957_p9 = pnand %p1956_p8, %p1950_p5 }
  0x1d   :  { %1960 = shalt.err (!%p1957_p9)
}
  0x1e   :  { %s2136_s20 = smov 64   ;;  %s2137_s21 = smov 4  }
  0x1f   :  { %75 = dma.hbm_to_vmem [thread:$0]  %s2427_s5, 1024, %s70_s30, [#allocation9], %s2136_s20, %s2136_s20, %s2137_s21  }
  0x20   :  { %s1969_s24 = scalar_lea.vmem %s98_s19, 1024  ;;  %p1974_p11 = scmp.lt.s32.totalorder %s98_s19, %s98_s19 }
  0x21   :  { %p1970_p10 = scmp.ne.s32.totalorder %s98_s19, %s1969_s24  ;;  %p1975_p12 = scmp.lt.s32.totalorder %s1969_s24, %s1969_s24 }
  0x23   :  { %p1976_p13 = por %p1975_p12, %p1974_p11 }
  0x25   :  { %p1977_p0 = pnand %p1976_p13, %p1970_p10 }
  0x27   :  { %1980 = shalt.err (!%p1977_p0)
}
  0x28   :  { %103 = dma.hbm_to_vmem [thread:$0]  %s2431_s9, 1024, %s98_s19, [#allocation12], %s2136_s20, %s2136_s20, %s2137_s21  }
  0x29   :  { %s2138_s27 = smov [#allocation14]   ;;  %s2139_s29 = smov [#allocation2]  }
  0x2a   :  { %s125_s28 = sshll.u32 %s2138_s27, 4  ;;  %s34_s5 = sshll.u32 %s2139_s29, 4  ;;  %s126_s28 = int_to_ptr.vmem [resolvable:$true] %s125_s28  ;;  %s35_s5 = int_to_ptr.vmem [resolvable:$true] %s34_s5 }
  0x2b   :  { %s1989_s0 = scalar_lea.vmem %s126_s28, 1024  ;;  %p1994_p2 = scmp.lt.s32.totalorder %s126_s28, %s126_s28 }
  0x2c   :  { %p1990_p1 = scmp.ne.s32.totalorder %s126_s28, %s1989_s0  ;;  %p1995_p3 = scmp.lt.s32.totalorder %s1989_s0, %s1989_s0 }
  0x2e   :  { %p1996_p4 = por %p1995_p3, %p1994_p2 }
  0x30   :  { %p1997_p5 = pnand %p1996_p4, %p1990_p1 }
  0x32   :  { %2000 = shalt.err (!%p1997_p5)
}
  0x33   :  { %131 = dma.hbm_to_vmem [thread:$0]  %s2435_s13, 1024, %s126_s28, [#allocation15], %s2136_s20, %s2136_s20, %s2137_s21  }
  0x34   :  { %s2009_s9 = scalar_lea.vmem %s35_s5, 128  ;;  %p2014_p7 = scmp.lt.s32.totalorder %s35_s5, %s35_s5 }
  0x35   :  { %p2010_p6 = scmp.ne.s32.totalorder %s35_s5, %s2009_s9  ;;  %p2015_p8 = scmp.lt.s32.totalorder %s2009_s9, %s2009_s9 }
  0x37   :  { %p2016_p9 = por %p2015_p8, %p2014_p7 }
  0x39   :  { %p2017_p10 = pnand %p2016_p9, %p2010_p6 }
  0x3b   :  { %2020 = shalt.err (!%p2017_p10)
}
  0x3c   :  { %s2443_s22 = sld [smem:[#allocation24_spill]]  ;;  %s2140_s23 = smov [#allocation7]  }
  0x3d   :  { %s55_s24 = sshll.u32 %s2140_s23, 4  ;;  %s2141_s25 = smov [#allocation10]   ;;  %s56_s24 = int_to_ptr.vmem [resolvable:$true] %s55_s24 }
  0x3e   :  { %s83_s26 = sshll.u32 %s2141_s25, 4  ;;  %s2029_s27 = scalar_lea.vmem %s56_s24, 1024  ;;  %s84_s26 = int_to_ptr.vmem [resolvable:$true] %s83_s26 }
  0x3f   :  { %p2030_p11 = scmp.ne.s32.totalorder %s56_s24, %s2029_s27  ;;  %p2034_p12 = scmp.lt.s32.totalorder %s56_s24, %s56_s24 }
  0x40   :  { %p2035_p13 = scmp.lt.s32.totalorder %s2029_s27, %s2029_s27 }
  0x42   :  { %37 = dma.hbm_to_vmem [thread:$0]  %s2443_s22, 128, %s35_s5, [#allocation3]  }
  0x43   :  { %p2036_p0 = por %p2035_p13, %p2034_p12 }
  0x45   :  { %p2037_p1 = pnand %p2036_p0, %p2030_p11 }
  0x47   :  { %2040 = shalt.err (!%p2037_p1)
}
  0x48   :  { %61 = dma.hbm_to_vmem [thread:$0]  %s2425_s3, 1024, %s56_s24, [#allocation6], %s2136_s20, %s2136_s20, %s2137_s21  }
  0x49   :  { %s2049_s29 = scalar_lea.vmem %s84_s26, 1024  ;;  %p2054_p3 = scmp.lt.s32.totalorder %s84_s26, %s84_s26 }
  0x4a   :  { %p2050_p2 = scmp.ne.s32.totalorder %s84_s26, %s2049_s29  ;;  %p2055_p4 = scmp.lt.s32.totalorder %s2049_s29, %s2049_s29 }
  0x4c   :  { %p2056_p5 = por %p2055_p4, %p2054_p3 }
  0x4e   :  { %p2057_p6 = pnand %p2056_p5, %p2050_p2 }
  0x50   :  { %2060 = shalt.err (!%p2057_p6)
}
  0x51   :  { %89 = dma.hbm_to_vmem [thread:$0]  %s2429_s7, 1024, %s84_s26, [#allocation9], %s2136_s20, %s2136_s20, %s2137_s21  }
  0x52   :  { %s2142_s30 = smov [#allocation13]   ;;  %s2143_s9 = smov [#allocation16]  }
  0x53   :  { %s111_s18 = sshll.u32 %s2142_s30, 4  ;;  %s139_s3 = sshll.u32 %s2143_s9, 4  ;;  %s112_s18 = int_to_ptr.vmem [resolvable:$true] %s111_s18  ;;  %s140_s3 = int_to_ptr.vmem [resolvable:$true] %s139_s3 }
  0x54   :  { %s2069_s19 = scalar_lea.vmem %s112_s18, 1024  ;;  %p2074_p8 = scmp.lt.s32.totalorder %s112_s18, %s112_s18 }
  0x55   :  { %p2070_p7 = scmp.ne.s32.totalorder %s112_s18, %s2069_s19  ;;  %p2075_p9 = scmp.lt.s32.totalorder %s2069_s19, %s2069_s19 }
  0x57   :  { %p2076_p10 = por %p2075_p9, %p2074_p8 }
  0x59   :  { %p2077_p11 = pnand %p2076_p10, %p2070_p7 }
  0x5b   :  { %2080 = shalt.err (!%p2077_p11)
}
  0x5c   :  { %117 = dma.hbm_to_vmem [thread:$0]  %s2433_s11, 1024, %s112_s18, [#allocation12], %s2136_s20, %s2136_s20, %s2137_s21  }
  0x5d   :  { %s2089_s7 = scalar_lea.vmem %s140_s3, 8192  ;;  %p2094_p13 = scmp.lt.s32.totalorder %s140_s3, %s140_s3 }
  0x5e   :  { %p2090_p12 = scmp.ne.s32.totalorder %s140_s3, %s2089_s7  ;;  %p2095_p0 = scmp.lt.s32.totalorder %s2089_s7, %s2089_s7 }
  0x60   :  { %p2096_p1 = por %p2095_p0, %p2094_p13 }
  0x62   :  { %p2097_p2 = pnand %p2096_p1, %p2090_p12 }
  0x64   :  { %2100 = shalt.err (!%p2097_p2)
}
  0x65   :  { %s2144_s23 = smov 512   ;;  %s2145_s24 = smov 32  }
  0x66   :  { %145 = dma.hbm_to_vmem [thread:$0]  %s2437_s15, 8192, %s140_s3, [#allocation15], %s2144_s23, %s2144_s23, %s2145_s24  }
  0x67   :  { %2121 = dma.done.wait [#allocation3], 128  }
  0x68   :  { %2122 = vsyncadd [#allocation3], 4294967168 }
  0x69   :  { %2123 = dma.done.wait [#allocation6], 1088  }
  0x6a   :  { %2124 = vsyncadd [#allocation6], 4294966208 }
  0x6b   :  { %2125 = dma.done.wait [#allocation9], 2048  }
  0x6c   :  { %2126 = vsyncadd [#allocation9], 4294965248 }
  0x6d   :  { %2127 = dma.done.wait [#allocation12], 2048  }
  0x6e   :  { %2128 = vsyncadd [#allocation12], 4294965248 }
  0x6f   :  { %2129 = dma.done.wait [#allocation15], 9216  }
  0x70   :  { %2130 = vsyncadd [#allocation15], 4294958080  ;;  %v2146_v0 = vmov 0.0   ;;  %vm2147_vm0 = vmmov 0   ;;  %vm190_vm1 = vcmask 1043456   ;;  %v176_v2 = vld [vmem:[#allocation2] sm:$0xff] }
  0x71   :  { %1712 = vmatprep.subr.bf16.mxu0 %v2146_v0  ;;  %1714 = vmatprep.mubr.msk.bf16.mxu0 %vm2147_vm0, %v2146_v0  ;;  %v178_v1 = vld [vmem:[#allocation5] sm:$0xf]  ;;  %v177_v4 = vpack.c.bf16 %v176_v2, %v176_v2  ;;  %vm186_vm2 = vcmask 64512   ;;  %v1856_v6 = vld [vmem:[#allocation7 + $0x30] sm:$0xff]   ;;  %v1857_v7 = vld [vmem:[#allocation7 + $0x28] sm:$0xff]  }
  0x72   :  { %1718 = vmatprep.subr.bf16.mxu1 %v2146_v0  ;;  %1734 = vmatprep.mubr.msk.bf16.mxu1 %vm2147_vm0, %v2146_v0  ;;  %v192_v3 = vsel %vm190_vm1, %v178_v1, 0  ;;  %v1855_v5 = vld [vmem:[#allocation7 + $0x38] sm:$0xff]   ;;  %v1858_v8 = vld [vmem:[#allocation7 + $0x20] sm:$0xff]   ;;  %v1860_v10 = vld [vmem:[#allocation7 + $0x10] sm:$0xff]  }
  0x73   :  { %1713 = vmatpush3.bf16.msra.mxu0 %v192_v3  ;;  %1719 = vmatpush3.bf16.msra.mxu1 %v1855_v5  ;;  %v1859_v9 = vld [vmem:[#allocation7 + $0x18] sm:$0xff]   ;;  %v1861_v11 = vld [vmem:[#allocation7 + $0x8] sm:$0xff]   ;;  %v1862_v12 = vld [vmem:[#allocation7] sm:$0xff]  }
  0x74   :  { %1738 = vmatprep.subr.bf16.mxu0 %v2146_v0  ;;  %1720 = vmatprep.subr.bf16.mxu1 %v2146_v0  ;;  %v1863_v13 = vld [vmem:[#allocation8 + $0x38] sm:$0xff]   ;;  %v1864_v14 = vld [vmem:[#allocation8 + $0x30] sm:$0xff]   ;;  %v1865_v15 = vld [vmem:[#allocation8 + $0x28] sm:$0xff]  }
  0x75   :  { %v1536_v16 = vld [vmem:[%s2424_s2] ss:$0 sm:$0xff]  ;;  %v1866_v23 = vld [vmem:[#allocation8 + $0x20] sm:$0xff]   ;;  %v1867_v24 = vld [vmem:[#allocation8 + $0x18] sm:$0xff]  }
  0x76   :  { %1715 = vmatmul.mubr.msk.bf16.vlgmr.msra.gmra.mxu0 %vm186_vm2, %v177_v4  ;;  %v1868_v25 = vld [vmem:[#allocation8 + $0x10] sm:$0xff]   ;;  %v1869_v26 = vld [vmem:[#allocation8 + $0x8] sm:$0xff]   ;;  %v1870_v27 = vld [vmem:[#allocation8] sm:$0xff]  }
  0x77   :  { %1754 = vmatprep.mubr.msk.bf16.mxu0 %vm2147_vm0, %v2146_v0  ;;  %1721 = vmatpush3.bf16.msra.mxu1 %v1856_v6  ;;  %v1538_v28 = vld [vmem:[%s2426_s4] ss:$0 sm:$0xff]  ;;  %v1871_v36 = vld [vmem:[#allocation10 + $0x38] sm:$0xff]   ;;  %v1873_v38 = vld [vmem:[#allocation10 + $0x28] sm:$0xff]  }
  0x78   :  { %1722 = vmatprep.subr.bf16.mxu1 %v2146_v0  ;;  %1739 = vmatpush3.bf16.msra.mxu0 %v1863_v13  ;;  %v1872_v37 = vld [vmem:[#allocation10 + $0x30] sm:$0xff]   ;;  %v1874_v39 = vld [vmem:[#allocation10 + $0x20] sm:$0xff]   ;;  %v1875_v40 = vld [vmem:[#allocation10 + $0x18] sm:$0xff]  }
  0x79   :  { %1740 = vmatprep.subr.bf16.mxu0 %v2146_v0  ;;  %v1876_v41 = vld [vmem:[#allocation10 + $0x10] sm:$0xff]   ;;  %v1877_v42 = vld [vmem:[#allocation10 + $0x8] sm:$0xff]   ;;  %v1878_v43 = vld [vmem:[#allocation10] sm:$0xff]  }
  0x7a   :  { %v1879_v44 = vld [vmem:[#allocation11 + $0x38] sm:$0xff]   ;;  %v1880_v45 = vld [vmem:[#allocation11 + $0x30] sm:$0xff]   ;;  %v1881_v46 = vld [vmem:[#allocation11 + $0x28] sm:$0xff]  }
  0x7b   :  { %1723 = vmatpush3.bf16.msra.mxu1 %v1857_v7  ;;  %v1547_v47 = vld [vmem:[%s2428_s6] ss:$0 sm:$0xff]  ;;  %v1882_v57 = vld [vmem:[#allocation11 + $0x20] sm:$0xff]   ;;  %v1883_v58 = vld [vmem:[#allocation11 + $0x18] sm:$0xff]  }
  0x7c   :  { %1724 = vmatprep.subr.bf16.mxu1 %v2146_v0  ;;  %1741 = vmatpush3.bf16.msra.mxu0 %v1864_v14  ;;  %v1884_v59 = vld [vmem:[#allocation11 + $0x10] sm:$0xff]   ;;  %v1885_v60 = vld [vmem:[#allocation11 + $0x8] sm:$0xff]   ;;  %v1886_v61 = vld [vmem:[#allocation11] sm:$0xff]  }
  0x7d   :  { %1742 = vmatprep.subr.bf16.mxu0 %v2146_v0  ;;  %v1556_v62 = vld [vmem:[%s2430_s8] ss:$0 sm:$0xff]  ;;  %v1887_v7 = vld [vmem:[#allocation13 + $0x38] sm:$0xff]   ;;  %v1893_v13 = vld [vmem:[#allocation13 + $0x8] sm:$0xff]  }
  0x7e   :  { %v1894_v14 = vld [vmem:[#allocation13] sm:$0xff]  }
  0x7f   :  { %1725 = vmatpush3.bf16.msra.mxu1 %v1858_v8  ;;  %v1888_v8 = vld [vmem:[#allocation13 + $0x30] sm:$0xff]  }
  0x80   :  { %1726 = vmatprep.subr.bf16.mxu1 %v2146_v0  ;;  %1743 = vmatpush3.bf16.msra.mxu0 %v1865_v15  ;;  %v1895_v15 = vld [vmem:[#allocation14 + $0x38] sm:$0xff]  }
  0x81   :  { %1744 = vmatprep.subr.bf16.mxu0 %v2146_v0 }
  0x83   :  { %1727 = vmatpush3.bf16.msra.mxu1 %v1859_v9  ;;  %v1889_v9 = vld [vmem:[#allocation13 + $0x28] sm:$0xff]  }
  0x84   :  { %1728 = vmatprep.subr.bf16.mxu1 %v2146_v0  ;;  %1745 = vmatpush3.bf16.msra.mxu0 %v1866_v23 }
  0x85   :  { %1746 = vmatprep.subr.bf16.mxu0 %v2146_v0 }
  0x87   :  { %1729 = vmatpush3.bf16.msra.mxu1 %v1860_v10  ;;  %v1890_v10 = vld [vmem:[#allocation13 + $0x20] sm:$0xff]  }
  0x88   :  { %1730 = vmatprep.subr.bf16.mxu1 %v2146_v0  ;;  %1747 = vmatpush3.bf16.msra.mxu0 %v1867_v24 }
  0x89   :  { %1748 = vmatprep.subr.bf16.mxu0 %v2146_v0 }
  0x8b   :  { %1731 = vmatpush3.bf16.msra.mxu1 %v1861_v11  ;;  %v1891_v11 = vld [vmem:[#allocation13 + $0x18] sm:$0xff]  }
  0x8c   :  { %1732 = vmatprep.subr.bf16.mxu1 %v2146_v0  ;;  %1749 = vmatpush3.bf16.msra.mxu0 %v1868_v25 }
  0x8d   :  { %1750 = vmatprep.subr.bf16.mxu0 %v2146_v0 }
  0x8f   :  { %1733 = vmatpush3.bf16.msra.mxu1 %v1862_v12  ;;  %v1892_v12 = vld [vmem:[#allocation13 + $0x10] sm:$0xff]  }
  0x90   :  { %1758 = vmatprep.subr.bf16.mxu1 %v2146_v0  ;;  %1751 = vmatpush3.bf16.msra.mxu0 %v1869_v26 }
  0x91   :  { %1752 = vmatprep.subr.bf16.mxu0 %v2146_v0 }
  0x94   :  { %1753 = vmatpush3.bf16.msra.mxu0 %v1870_v27 }
  0x95   :  { %1778 = vmatprep.subr.bf16.mxu0 %v2146_v0 }
 0x136   :  { %v228_v17 = vpop.f32.mrf.mxu0 }
 0x137   :  { %v2308_v18 = vadd.f32 %v1536_v16, %v228_v17  ;;  %v1896_v16 = vld [vmem:[#allocation14 + $0x30] sm:$0xff]   ;;  %v1897_v17 = vld [vmem:[#allocation14 + $0x28] sm:$0xff]  }
 0x138   :  { %v1716_v19 = vpop.f32.mrf.mxu0 }
 0x139   :  { %v234_v20 = vpack.c.bf16 %v2308_v18, %v2308_v18 }
 0x13a   :  { %v231_v21 = vpop.f32.mrf.mxu0 }
 0x13b   :  { %1735 = vmatmul.mubr.bf16.vlgmr.msra.gmra.mxu1 %v234_v20 }
 0x13c   :  { %v1717_v22 = vpop.f32.mrf.mxu0  ;;  %1774 = vmatprep.mubr.msk.bf16.mxu1 %vm2147_vm0, %v2146_v0  ;;  %1759 = vmatpush3.bf16.msra.mxu1 %v1871_v36 }
 0x13d   :  { %1760 = vmatprep.subr.bf16.mxu1 %v2146_v0 }
 0x140   :  { %1761 = vmatpush3.bf16.msra.mxu1 %v1872_v37 }
 0x141   :  { %1762 = vmatprep.subr.bf16.mxu1 %v2146_v0 }
 0x144   :  { %1763 = vmatpush3.bf16.msra.mxu1 %v1873_v38 }
 0x145   :  { %1764 = vmatprep.subr.bf16.mxu1 %v2146_v0 }
 0x148   :  { %1765 = vmatpush3.bf16.msra.mxu1 %v1874_v39 }
 0x149   :  { %1766 = vmatprep.subr.bf16.mxu1 %v2146_v0 }
 0x14c   :  { %1767 = vmatpush3.bf16.msra.mxu1 %v1875_v40 }
 0x14d   :  { %1768 = vmatprep.subr.bf16.mxu1 %v2146_v0 }
 0x150   :  { %1769 = vmatpush3.bf16.msra.mxu1 %v1876_v41  ;;  %v975_v41 = vld [vmem:[#allocation16 + $0x1c0] sm:$0xff] }
 0x151   :  { %1770 = vmatprep.subr.bf16.mxu1 %v2146_v0 }
 0x154   :  { %1771 = vmatpush3.bf16.msra.mxu1 %v1877_v42  ;;  %v979_v42 = vld [vmem:[#allocation16 + $0x1e0] sm:$0xff] }
 0x155   :  { %1772 = vmatprep.subr.bf16.mxu1 %v2146_v0 }
 0x158   :  { %1773 = vmatpush3.bf16.msra.mxu1 %v1878_v43  ;;  %v976_v43 = vld [vmem:[#allocation16 + $0x1c8] sm:$0xff] }
 0x159   :  { %1798 = vmatprep.subr.bf16.mxu1 %v2146_v0 }
 0x1fb   :  { %v340_v29 = vpop.f32.mrf.mxu1 }
 0x1fc   :  { %v341_v30 = vadd.f32 %v1538_v28, %v340_v29  ;;  %v1898_v28 = vld [vmem:[#allocation14 + $0x20] sm:$0xff]   ;;  %v1899_v29 = vld [vmem:[#allocation14 + $0x18] sm:$0xff]  }
 0x1fd   :  { %v1736_v31 = vpop.f32.mrf.mxu1 }
 0x1fe   :  { %1903 = vtanh.f32 %v341_v30  ;;  %v1900_v30 = vld [vmem:[#allocation14 + $0x10] sm:$0xff]   ;;  %v1901_v31 = vld [vmem:[#allocation14 + $0x8] sm:$0xff]  }
 0x1ff   :  { %v343_v32 = vpop.f32.mrf.mxu1 }
 0x200   :  { %v1902_v32 = vld [vmem:[#allocation14] sm:$0xff]  }
 0x201   :  { %v1737_v33 = vpop.f32.mrf.mxu1 }
 0x202   :  { %v1574_v33 = vld [vmem:[%s2434_s12] ss:$0 sm:$0xff] }
 0x20b   :  { %v1904_v34 = vpop.eup %1903 }
 0x20c   :  { %v347_v35 = vpack.c.bf16 %v1904_v34, %v1904_v34 }
 0x20e   :  { %1755 = vmatmul.mubr.bf16.vlgmr.msra.gmra.mxu0 %v347_v35 }
 0x20f   :  { %1794 = vmatprep.mubr.msk.bf16.mxu0 %vm2147_vm0, %v2146_v0  ;;  %1779 = vmatpush3.bf16.msra.mxu0 %v1879_v44  ;;  %v1649_v44 = vcombine.high %v975_v41, %v979_v42 }
 0x210   :  { %1780 = vmatprep.subr.bf16.mxu0 %v2146_v0 }
 0x213   :  { %1781 = vmatpush3.bf16.msra.mxu0 %v1880_v45  ;;  %v1648_v45 = vcombine.low %v975_v41, %v979_v42  ;;  %v920_v41 = vld [vmem:[#allocation16 + $0x8] sm:$0xff] }
 0x214   :  { %1782 = vmatprep.subr.bf16.mxu0 %v2146_v0  ;;  %v924_v42 = vld [vmem:[#allocation16 + $0x28] sm:$0xff] }
 0x217   :  { %1783 = vmatpush3.bf16.msra.mxu0 %v1881_v46 }
 0x218   :  { %1784 = vmatprep.subr.bf16.mxu0 %v2146_v0 }
 0x21b   :  { %1785 = vmatpush3.bf16.msra.mxu0 %v1882_v57  ;;  %v963_v57 = vld [vmem:[#allocation16 + $0x160] sm:$0xff] }
 0x21c   :  { %1786 = vmatprep.subr.bf16.mxu0 %v2146_v0 }
 0x21f   :  { %1787 = vmatpush3.bf16.msra.mxu0 %v1883_v58  ;;  %v960_v58 = vld [vmem:[#allocation16 + $0x148] sm:$0xff] }
 0x220   :  { %1788 = vmatprep.subr.bf16.mxu0 %v2146_v0 }
 0x223   :  { %1789 = vmatpush3.bf16.msra.mxu0 %v1884_v59 }
 0x224   :  { %1790 = vmatprep.subr.bf16.mxu0 %v2146_v0 }
 0x227   :  { %1791 = vmatpush3.bf16.msra.mxu0 %v1885_v60 }
 0x228   :  { %1792 = vmatprep.subr.bf16.mxu0 %v2146_v0 }
 0x22b   :  { %1793 = vmatpush3.bf16.msra.mxu0 %v1886_v61  ;;  %v964_v61 = vld [vmem:[#allocation16 + $0x168] sm:$0xff] }
 0x22c   :  { %1818 = vmatprep.subr.bf16.mxu0 %v2146_v0 }
 0x2ce   :  { %v453_v48 = vpop.f32.mrf.mxu0 }
 0x2cf   :  { %v454_v49 = vadd.f32 %v1547_v47, %v453_v48  ;;  %v967_v48 = vld [vmem:[#allocation16 + $0x180] sm:$0xff] }
 0x2d0   :  { %v1756_v50 = vpop.f32.mrf.mxu0 }
 0x2d1   :  { %1905 = vtanh.f32 %v454_v49  ;;  %v971_v49 = vld [vmem:[#allocation16 + $0x1a0] sm:$0xff]  ;;  %v968_v50 = vld [vmem:[#allocation16 + $0x188] sm:$0xff] }
 0x2d2   :  { %v456_v51 = vpop.f32.mrf.mxu0 }
 0x2d3   :  { %v1641_v51 = vcombine.high %v967_v48, %v971_v49 }
 0x2d4   :  { %v1757_v52 = vpop.f32.mrf.mxu0 }
 0x2d5   :  { %v972_v52 = vld [vmem:[#allocation16 + $0x1a8] sm:$0xff] }
 0x2de   :  { %v1906_v53 = vpop.eup %1905 }
 0x2df   :  { %v460_v54 = vadd.f32 %v1906_v53, %v2308_v18  ;;  %v1565_v18 = vld [vmem:[%s2432_s10] ss:$0 sm:$0xff]  ;;  %v1640_v53 = vcombine.low %v967_v48, %v971_v49 }
 0x2e1   :  { %1907 = vtanh.f32 %v460_v54  ;;  %v1642_v54 = vcombine.low %v968_v50, %v972_v52 }
 0x2ee   :  { %v2339_v55 = vpop.eup %1907 }
 0x2ef   :  { %v462_v56 = vpack.c.bf16 %v2339_v55, %v2339_v55 }
 0x2f1   :  { %1775 = vmatmul.mubr.bf16.vlgmr.msra.gmra.mxu1 %v462_v56  ;;  %v959_v56 = vld [vmem:[#allocation16 + $0x140] sm:$0xff] }
 0x2f2   :  { %1814 = vmatprep.mubr.msk.bf16.mxu1 %vm2147_vm0, %v2146_v0  ;;  %1799 = vmatpush3.bf16.msra.mxu1 %v1887_v7  ;;  %v1632_v59 = vcombine.low %v959_v56, %v963_v57  ;;  %v1633_v60 = vcombine.high %v959_v56, %v963_v57  ;;  %v943_v7 = vld [vmem:[#allocation16 + $0xc0] sm:$0xff] }
 0x2f3   :  { %1800 = vmatprep.subr.bf16.mxu1 %v2146_v0 }
 0x2f6   :  { %1801 = vmatpush3.bf16.msra.mxu1 %v1888_v8  ;;  %v947_v8 = vld [vmem:[#allocation16 + $0xe0] sm:$0xff] }
 0x2f7   :  { %1802 = vmatprep.subr.bf16.mxu1 %v2146_v0 }
 0x2fa   :  { %1803 = vmatpush3.bf16.msra.mxu1 %v1889_v9  ;;  %v2148_v9 = vmov 0  }
 0x2fb   :  { %1804 = vmatprep.subr.bf16.mxu1 %v2146_v0 }
 0x2fe   :  { %1805 = vmatpush3.bf16.msra.mxu1 %v1890_v10  ;;  %v944_v10 = vld [vmem:[#allocation16 + $0xc8] sm:$0xff] }
 0x2ff   :  { %1806 = vmatprep.subr.bf16.mxu1 %v2146_v0 }
 0x302   :  { %1807 = vmatpush3.bf16.msra.mxu1 %v1891_v11  ;;  %v948_v11 = vld [vmem:[#allocation16 + $0xe8] sm:$0xff] }
 0x303   :  { %1808 = vmatprep.subr.bf16.mxu1 %v2146_v0 }
 0x306   :  { %1809 = vmatpush3.bf16.msra.mxu1 %v1892_v12 }
 0x307   :  { %1810 = vmatprep.subr.bf16.mxu1 %v2146_v0 }
 0x30a   :  { %1811 = vmatpush3.bf16.msra.mxu1 %v1893_v13 }
 0x30b   :  { %1812 = vmatprep.subr.bf16.mxu1 %v2146_v0 }
 0x30e   :  { %1813 = vmatpush3.bf16.msra.mxu1 %v1894_v14  ;;  %v1617_v14 = vcombine.high %v943_v7, %v947_v8 }
 0x30f   :  { %1345 = vmatprep.subr.bf16.mxu1 %v1649_v44 }
 0x3b1   :  { %v568_v63 = vpop.f32.mrf.mxu1 }
 0x3b2   :  { %v569_v1 = vadd.f32 %v1556_v62, %v568_v63  ;;  %v951_v62 = vld [vmem:[#allocation16 + $0x100] sm:$0xff] }
 0x3b3   :  { %v1776_v2 = vpop.f32.mrf.mxu1  ;;  %v955_v63 = vld [vmem:[#allocation16 + $0x120] sm:$0xff] }
 0x3b4   :  { %1909 = vtanh.f32 %v569_v1  ;;  %v1634_v1 = vcombine.low %v960_v58, %v964_v61  ;;  %v1635_v2 = vcombine.high %v960_v58, %v964_v61  ;;  %v1624_v12 = vcombine.low %v951_v62, %v955_v63  ;;  %v969_v58 = vld [vmem:[#allocation16 + $0x190] sm:$0xff]  ;;  %v974_v61 = vld [vmem:[#allocation16 + $0x1b8] sm:$0xff] }
 0x3b5   :  { %v571_v3 = vpop.f32.mrf.mxu1 }
 0x3b6   :  { %v1625_v3 = vcombine.high %v951_v62, %v955_v63 }
 0x3b7   :  { %v1777_v4 = vpop.f32.mrf.mxu1 }
 0x3b8   :  { %v952_v4 = vld [vmem:[#allocation16 + $0x108] sm:$0xff] }
 0x3c1   :  { %v1910_v5 = vpop.eup %1909 }
 0x3c2   :  { %v575_v6 = vpack.c.bf16 %v1910_v5, %v1910_v5  ;;  %v956_v5 = vld [vmem:[#allocation16 + $0x128] sm:$0xff] }
 0x3c3   :  { %v1626_v13 = vcombine.low %v952_v4, %v956_v5 }
 0x3c4   :  { %1795 = vmatmul.mubr.bf16.vlgmr.msra.gmra.mxu0 %v575_v6  ;;  %v1627_v6 = vcombine.high %v952_v4, %v956_v5  ;;  %v965_v4 = vld [vmem:[#allocation16 + $0x170] sm:$0xff]  ;;  %v962_v5 = vld [vmem:[#allocation16 + $0x158] sm:$0xff] }
 0x3c5   :  { %1834 = vmatprep.mubr.msk.bf16.mxu0 %vm2147_vm0, %v2146_v0  ;;  %1819 = vmatpush3.bf16.msra.mxu0 %v1895_v15  ;;  %v935_v15 = vld [vmem:[#allocation16 + $0x80] sm:$0xff] }
 0x3c6   :  { %1820 = vmatprep.subr.bf16.mxu0 %v2146_v0 }
 0x3c9   :  { %1821 = vmatpush3.bf16.msra.mxu0 %v1896_v16  ;;  %v1619_v16 = vcombine.high %v944_v10, %v948_v11 }
 0x3ca   :  { %1822 = vmatprep.subr.bf16.mxu0 %v2146_v0 }
 0x3cd   :  { %1823 = vmatpush3.bf16.msra.mxu0 %v1897_v17  ;;  %v939_v17 = vld [vmem:[#allocation16 + $0xa0] sm:$0xff] }
 0x3ce   :  { %1824 = vmatprep.subr.bf16.mxu0 %v2146_v0 }
 0x3d1   :  { %1825 = vmatpush3.bf16.msra.mxu0 %v1898_v28  ;;  %v1609_v28 = vcombine.high %v935_v15, %v939_v17 }
 0x3d2   :  { %1826 = vmatprep.subr.bf16.mxu0 %v2146_v0 }
 0x3d5   :  { %1827 = vmatpush3.bf16.msra.mxu0 %v1899_v29 }
 0x3d6   :  { %1828 = vmatprep.subr.bf16.mxu0 %v2146_v0 }
 0x3d9   :  { %1829 = vmatpush3.bf16.msra.mxu0 %v1900_v30 }
 0x3da   :  { %1830 = vmatprep.subr.bf16.mxu0 %v2146_v0 }
 0x3dd   :  { %1831 = vmatpush3.bf16.msra.mxu0 %v1901_v31  ;;  %v927_v31 = vld [vmem:[#allocation16 + $0x40] sm:$0xff] }
 0x3de   :  { %1832 = vmatprep.subr.bf16.mxu0 %v2146_v0  ;;  %v980_v0 = vld [vmem:[#allocation16 + $0x1e8] sm:$0xff] }
 0x3df   :  { %v1650_v46 = vcombine.low %v976_v43, %v980_v0  ;;  %v1651_v47 = vcombine.high %v976_v43, %v980_v0 }
 0x3e1   :  { %1833 = vmatpush3.bf16.msra.mxu0 %v1902_v32  ;;  %v931_v32 = vld [vmem:[#allocation16 + $0x60] sm:$0xff] }
 0x3e2   :  { %1386 = vmatprep.subr.bf16.mxu0 %v1651_v47  ;;  %v1600_v43 = vcombine.low %v927_v31, %v931_v32  ;;  %v1594_v47 = vcombine.low %v920_v41, %v924_v42 }
 0x484   :  { %v681_v19 = vpop.f32.mrf.mxu0 }
 0x485   :  { %v682_v20 = vadd.f32 %v1565_v18, %v681_v19  ;;  %v936_v18 = vld [vmem:[#allocation16 + $0x88] sm:$0xff] }
 0x486   :  { %v1796_v21 = vpop.f32.mrf.mxu0  ;;  %v940_v19 = vld [vmem:[#allocation16 + $0xa8] sm:$0xff] }
 0x487   :  { %1911 = vtanh.f32 %v682_v20  ;;  %v2382_v20 = vld [vmem:[#allocation16 + $0x1d0] sm:$0xff]  ;;  %v1611_v30 = vcombine.high %v936_v18, %v940_v19 }
 0x488   :  { %v684_v22 = vpop.f32.mrf.mxu0  ;;  %v2384_v21 = vld [vmem:[#allocation16 + $0x1f0] sm:$0xff] }
 0x489   :  { %v2386_v22 = vld [vmem:[#allocation16 + $0x1d8] sm:$0xff]  ;;  %v1653_v48 = vcombine.high %v2382_v20, %v2384_v21 }
 0x48a   :  { %v1797_v23 = vpop.f32.mrf.mxu0 }
 0x48b   :  { %v1616_v23 = vcombine.low %v943_v7, %v947_v8 }
 0x494   :  { %v1912_v24 = vpop.eup %1911 }
 0x495   :  { %v688_v25 = vadd.f32 %v1912_v24, %v2339_v55  ;;  %v1643_v55 = vcombine.high %v968_v50, %v972_v52  ;;  %v1652_v24 = vcombine.low %v2382_v20, %v2384_v21  ;;  %v1583_v50 = vld [vmem:[%s2436_s14] ss:$0 sm:$0xff]  ;;  %v946_v21 = vld [vmem:[#allocation16 + $0xd8] sm:$0xff] }
 0x496   :  { %v949_v20 = vld [vmem:[#allocation16 + $0xf0] sm:$0xff] }
 0x497   :  { %1913 = vtanh.f32 %v688_v25  ;;  %v2390_v25 = vld [vmem:[#allocation16 + $0x1f8] sm:$0xff] }
 0x498   :  { %v1654_v29 = vcombine.low %v2386_v22, %v2390_v25  ;;  %v1655_v49 = vcombine.high %v2386_v22, %v2390_v25  ;;  %v950_v22 = vld [vmem:[#allocation16 + $0xf8] sm:$0xff] }
 0x4a4   :  { %v2369_v26 = vpop.eup %1913 }
 0x4a5   :  { %v690_v27 = vpack.c.bf16 %v2369_v26, %v2369_v26 }
 0x4a7   :  { %1815 = vmatmul.mubr.bf16.vlgmr.msra.gmra.mxu1 %v690_v27  ;;  %v1618_v27 = vcombine.low %v944_v10, %v948_v11  ;;  %v953_v11 = vld [vmem:[#allocation16 + $0x110] sm:$0xff] }
 0x4a8   :  { %1346 = vmatpush1.bf16.msra.mxu1 %v1648_v45  ;;  %1377 = vmatprep.mubr.bf16.mxu1 %v2148_v9  ;;  %v1595_v45 = vcombine.high %v920_v41, %v924_v42 }
 0x4a9   :  { %1347 = vmatprep.subr.bf16.mxu1 %v1641_v51 }
 0x4ac   :  { %1348 = vmatpush1.bf16.msra.mxu1 %v1640_v53 }
 0x4ad   :  { %1349 = vmatprep.subr.bf16.mxu1 %v1633_v60  ;;  %v970_v60 = vld [vmem:[#allocation16 + $0x198] sm:$0xff] }
 0x4ae   :  { %v1646_v7 = vcombine.low %v970_v60, %v974_v61 }
 0x4b0   :  { %1350 = vmatpush1.bf16.msra.mxu1 %v1632_v59  ;;  %v973_v59 = vld [vmem:[#allocation16 + $0x1b0] sm:$0xff] }
 0x4b1   :  { %1351 = vmatprep.subr.bf16.mxu1 %v1625_v3  ;;  %v961_v3 = vld [vmem:[#allocation16 + $0x150] sm:$0xff] }
 0x4b2   :  { %v1637_v8 = vcombine.high %v961_v3, %v965_v4 }
 0x4b4   :  { %1352 = vmatpush1.bf16.msra.mxu1 %v1624_v12  ;;  %v957_v12 = vld [vmem:[#allocation16 + $0x130] sm:$0xff] }
 0x4b5   :  { %1353 = vmatprep.subr.bf16.mxu1 %v1617_v14  ;;  %v958_v14 = vld [vmem:[#allocation16 + $0x138] sm:$0xff] }
 0x4b8   :  { %1354 = vmatpush1.bf16.msra.mxu1 %v1616_v23  ;;  %v1628_v23 = vcombine.low %v953_v11, %v957_v12 }
 0x4b9   :  { %1355 = vmatprep.subr.bf16.mxu1 %v1609_v28  ;;  %v941_v28 = vld [vmem:[#allocation16 + $0xb0] sm:$0xff] }
 0x567   :  { %v796_v34 = vpop.f32.mrf.mxu1 }
 0x568   :  { %v797_v35 = vadd.f32 %v1574_v33, %v796_v34  ;;  %v928_v33 = vld [vmem:[#allocation16 + $0x48] sm:$0xff] }
 0x569   :  { %v1816_v36 = vpop.f32.mrf.mxu1  ;;  %v932_v34 = vld [vmem:[#allocation16 + $0x68] sm:$0xff] }
 0x56a   :  { %1915 = vtanh.f32 %v797_v35  ;;  %v1608_v35 = vcombine.low %v935_v15, %v939_v17  ;;  %v1610_v36 = vcombine.low %v936_v18, %v940_v19  ;;  %v1602_v44 = vcombine.low %v928_v33, %v932_v34  ;;  %v945_v19 = vld [vmem:[#allocation16 + $0xd0] sm:$0xff] }
 0x56b   :  { %v799_v37 = vpop.f32.mrf.mxu1  ;;  %v1636_v15 = vcombine.low %v961_v3, %v965_v4  ;;  %v1629_v17 = vcombine.high %v953_v11, %v957_v12  ;;  %v1621_v25 = vcombine.high %v945_v19, %v949_v20 }
 0x56c   :  { %v1601_v37 = vcombine.high %v927_v31, %v931_v32  ;;  %1356 = vmatpush1.bf16.msra.mxu1 %v1608_v35  ;;  %v1620_v31 = vcombine.low %v945_v19, %v949_v20  ;;  %v1622_v32 = vcombine.low %v946_v21, %v950_v22  ;;  %v929_v35 = vld [vmem:[#allocation16 + $0x50] sm:$0xff] }
 0x56d   :  { %v1817_v38 = vpop.f32.mrf.mxu1 }
 0x56e   :  { %v1603_v38 = vcombine.high %v928_v33, %v932_v34  ;;  %1357 = vmatprep.subr.bf16.mxu1 %v1601_v37  ;;  %v930_v37 = vld [vmem:[#allocation16 + $0x58] sm:$0xff] }
 0x570   :  { %1358 = vmatpush1.bf16.msra.mxu1 %v1600_v43  ;;  %v921_v43 = vld [vmem:[#allocation16 + $0x10] sm:$0xff] }
 0x577   :  { %v1916_v39 = vpop.eup %1915 }
 0x578   :  { %v803_v40 = vpack.c.bf16 %v1916_v39, %v1916_v39  ;;  %v919_v39 = vld [vmem:[#allocation16] sm:$0xff] }
 0x57a   :  { %1835 = vmatmul.mubr.bf16.vlgmr.msra.gmra.mxu0 %v803_v40  ;;  %v923_v40 = vld [vmem:[#allocation16 + $0x20] sm:$0xff] }
 0x57b   :  { %1387 = vmatpush1.bf16.msra.mxu0 %v1650_v46  ;;  %1418 = vmatprep.mubr.bf16.mxu0 %v2148_v9  ;;  %v1593_v0 = vcombine.high %v919_v39, %v923_v40  ;;  %v1592_v46 = vcombine.low %v919_v39, %v923_v40 }
 0x57c   :  { %1388 = vmatprep.subr.bf16.mxu0 %v1643_v55 }
 0x57d   :  { %1359 = vmatprep.subr.bf16.mxu1 %v1593_v0  ;;  %v922_v0 = vld [vmem:[#allocation16 + $0x18] sm:$0xff] }
 0x57e   :  { %1360 = vmatpush1.bf16.msra.mxu1 %v1592_v46 }
 0x57f   :  { %1389 = vmatpush1.bf16.msra.mxu0 %v1642_v54  ;;  %1427 = vmatprep.subr.bf16.mxu1 %v1653_v48 }
 0x580   :  { %1390 = vmatprep.subr.bf16.mxu0 %v1635_v2  ;;  %v1647_v2 = vcombine.high %v970_v60, %v974_v61 }
 0x583   :  { %1391 = vmatpush1.bf16.msra.mxu0 %v1634_v1  ;;  %v1645_v1 = vcombine.high %v969_v58, %v973_v59 }
 0x584   :  { %1392 = vmatprep.subr.bf16.mxu0 %v1627_v6  ;;  %v966_v6 = vld [vmem:[#allocation16 + $0x178] sm:$0xff] }
 0x585   :  { %v1639_v10 = vcombine.high %v962_v5, %v966_v6 }
 0x587   :  { %1393 = vmatpush1.bf16.msra.mxu0 %v1626_v13  ;;  %v954_v13 = vld [vmem:[#allocation16 + $0x118] sm:$0xff] }
 0x588   :  { %1394 = vmatprep.subr.bf16.mxu0 %v1619_v16  ;;  %v1638_v16 = vcombine.low %v962_v5, %v966_v6  ;;  %v1631_v18 = vcombine.high %v954_v13, %v958_v14 }
 0x58b   :  { %1395 = vmatpush1.bf16.msra.mxu0 %v1618_v27  ;;  %v937_v27 = vld [vmem:[#allocation16 + $0x90] sm:$0xff] }
 0x58c   :  { %1396 = vmatprep.subr.bf16.mxu0 %v1611_v30  ;;  %v942_v30 = vld [vmem:[#allocation16 + $0xb8] sm:$0xff]  ;;  %v1613_v33 = vcombine.high %v937_v27, %v941_v28  ;;  %v1612_v39 = vcombine.low %v937_v27, %v941_v28 }
 0x58f   :  { %1397 = vmatpush1.bf16.msra.mxu0 %v1610_v36  ;;  %v933_v36 = vld [vmem:[#allocation16 + $0x70] sm:$0xff] }
 0x590   :  { %1398 = vmatprep.subr.bf16.mxu0 %v1603_v38  ;;  %v934_v38 = vld [vmem:[#allocation16 + $0x78] sm:$0xff]  ;;  %v1605_v41 = vcombine.high %v929_v35, %v933_v36  ;;  %v1604_v46 = vcombine.low %v929_v35, %v933_v36 }
 0x591   :  { %v1607_v42 = vcombine.high %v930_v37, %v934_v38 }
 0x593   :  { %1399 = vmatpush1.bf16.msra.mxu0 %v1602_v44  ;;  %v925_v44 = vld [vmem:[#allocation16 + $0x30] sm:$0xff] }
 0x594   :  { %1400 = vmatprep.subr.bf16.mxu0 %v1595_v45  ;;  %v926_v45 = vld [vmem:[#allocation16 + $0x38] sm:$0xff]  ;;  %v1597_v48 = vcombine.high %v921_v43, %v925_v44 }
 0x597   :  { %1401 = vmatpush1.bf16.msra.mxu0 %v1594_v47  ;;  %v1606_v47 = vcombine.low %v930_v37, %v934_v38 }
 0x598   :  { %1468 = vmatprep.subr.bf16.mxu0 %v1655_v49  ;;  %v1599_v49 = vcombine.high %v922_v0, %v926_v45 }
 0x63a   :  { %v909_v51 = vpop.f32.mrf.mxu0 }
 0x63b   :  { %v910_v52 = vadd.f32 %v1583_v50, %v909_v51  ;;  %v1596_v50 = vcombine.low %v921_v43, %v925_v44  ;;  %v1598_v51 = vcombine.low %v922_v0, %v926_v45 }
 0x63c   :  { %v1836_v53 = vpop.f32.mrf.mxu0 }
 0x63d   :  { %1917 = vtanh.f32 %v910_v52  ;;  %v985_v52 = vlaneseq }
 0x63e   :  { %v912_v54 = vpop.f32.mrf.mxu0 }
 0x63f   :  { %v986_v53 = vshrl.u32 %v985_v52, 7 }
 0x640   :  { %v1837_v55 = vpop.f32.mrf.mxu0 }
 0x641   :  { %v987_v54 = vsub.s32 0, %v986_v53  ;;  %v995_v55 = vsub.s32 2, %v986_v53  ;;  %v1003_v12 = vsub.s32 4, %v986_v53 }
 0x64a   :  { %v1918_v56 = vpop.eup %1917 }
 0x64b   :  { %v916_v57 = vadd.f32 %v1918_v56, %v2369_v26  ;;  %v1644_v26 = vcombine.low %v969_v58, %v973_v59  ;;  %v983_v56 = vld [vmem:[%s2438_s16] sm:$0xff]  ;;  %v999_v58 = vsub.s32 3, %v986_v53  ;;  %s2149_s16 = smov [#allocation17]  }
 0x64c   :  { %v988_v59 = vrot.slane %v983_v56, %v987_v54  ;;  %v996_v60 = vrot.slane %v983_v56, %v995_v55  ;;  %s1523_s0 = sshll.u32 %s2149_s16, 4  ;;  %s1524_s0 = int_to_ptr.vmem [resolvable:$true] %s1523_s0 }
 0x64d   :  { %1919 = vtanh.f32 %v916_v57  ;;  %v991_v57 = vsub.s32 1, %v986_v53  ;;  %s2101_s30 = scalar_lea.vmem %s1524_s0, 1024  ;;  %p2106_p4 = scmp.lt.s32.totalorder %s1524_s0, %s1524_s0 }
 0x64e   :  { %p2102_p3 = scmp.ne.s32.totalorder %s1524_s0, %s2101_s30  ;;  %p2107_p5 = scmp.lt.s32.totalorder %s2101_s30, %s2101_s30 }
 0x64f   :  { %v992_v61 = vrot.slane %v983_v56, %v991_v57 }
 0x650   :  { %p2108_p6 = por %p2107_p5, %p2106_p4 }
 0x652   :  { %p2109_p7 = pnand %p2108_p6, %p2102_p3 }
 0x65a   :  { %v1920_v62 = vpop.eup %1919 }
 0x65b   :  { %v2402_v63 = vpack.c.bf16 %v1920_v62, %v1920_v62  ;;  %v1000_v62 = vrot.slane %v983_v56, %v999_v58 }
 0x65d   :  { %1378 = vmatmul.mubr.bf16.vlgmr.msra.gmra.mxu1 %v2402_v63  ;;  %1419 = vmatmul.mubr.bf16.vlgmr.msra.gmra.mxu0 %v2402_v63 }
 0x65e   :  { %1428 = vmatpush1.bf16.msra.mxu1 %v1652_v24  ;;  %1469 = vmatpush1.bf16.msra.mxu0 %v1654_v29  ;;  %v1630_v24 = vcombine.low %v954_v13, %v958_v14  ;;  %v938_v29 = vld [vmem:[#allocation16 + $0x98] sm:$0xff]  ;;  %v1011_v13 = vsub.s32 6, %v986_v53  ;;  %v1007_v14 = vsub.s32 5, %v986_v53 }
 0x65f   :  { %1429 = vmatprep.subr.bf16.mxu1 %v1645_v1  ;;  %1470 = vmatprep.subr.bf16.mxu0 %v1647_v2  ;;  %v1615_v34 = vcombine.high %v938_v29, %v942_v30  ;;  %v1614_v40 = vcombine.low %v938_v29, %v942_v30 }
 0x660   :  { %1459 = vmatprep.mubr.bf16.mxu1 %v2148_v9  ;;  %1500 = vmatprep.mubr.bf16.mxu0 %v2148_v9  ;;  %v1623_v9 = vcombine.high %v946_v21, %v950_v22 }
 0x662   :  { %1430 = vmatpush1.bf16.msra.mxu1 %v1644_v26  ;;  %1471 = vmatpush1.bf16.msra.mxu0 %v1646_v7 }
 0x663   :  { %1431 = vmatprep.subr.bf16.mxu1 %v1637_v8  ;;  %1472 = vmatprep.subr.bf16.mxu0 %v1639_v10 }
 0x666   :  { %1432 = vmatpush1.bf16.msra.mxu1 %v1636_v15  ;;  %1473 = vmatpush1.bf16.msra.mxu0 %v1638_v16  ;;  %v1015_v15 = vsub.s32 7, %v986_v53  ;;  %v1004_v16 = vrot.slane %v983_v56, %v1003_v12 }
 0x667   :  { %1433 = vmatprep.subr.bf16.mxu1 %v1629_v17  ;;  %1474 = vmatprep.subr.bf16.mxu0 %v1631_v18  ;;  %v1012_v17 = vrot.slane %v983_v56, %v1011_v13  ;;  %v1008_v18 = vrot.slane %v983_v56, %v1007_v14 }
 0x668   :  { %v1016_v19 = vrot.slane %v983_v56, %v1015_v15 }
 0x66a   :  { %1434 = vmatpush1.bf16.msra.mxu1 %v1628_v23  ;;  %1475 = vmatpush1.bf16.msra.mxu0 %v1630_v24 }
 0x66b   :  { %1435 = vmatprep.subr.bf16.mxu1 %v1621_v25  ;;  %1476 = vmatprep.subr.bf16.mxu0 %v1623_v9 }
 0x66e   :  { %1436 = vmatpush1.bf16.msra.mxu1 %v1620_v31  ;;  %1477 = vmatpush1.bf16.msra.mxu0 %v1622_v32 }
 0x66f   :  { %1437 = vmatprep.subr.bf16.mxu1 %v1613_v33  ;;  %1478 = vmatprep.subr.bf16.mxu0 %v1615_v34 }
 0x672   :  { %1438 = vmatpush1.bf16.msra.mxu1 %v1612_v39  ;;  %1479 = vmatpush1.bf16.msra.mxu0 %v1614_v40 }
 0x673   :  { %1439 = vmatprep.subr.bf16.mxu1 %v1605_v41  ;;  %1480 = vmatprep.subr.bf16.mxu0 %v1607_v42 }
 0x676   :  { %1440 = vmatpush1.bf16.msra.mxu1 %v1604_v46  ;;  %1481 = vmatpush1.bf16.msra.mxu0 %v1606_v47 }
 0x677   :  { %1441 = vmatprep.subr.bf16.mxu1 %v1597_v48  ;;  %1482 = vmatprep.subr.bf16.mxu0 %v1599_v49 }
 0x67a   :  { %1442 = vmatpush1.bf16.msra.mxu1 %v1596_v50  ;;  %1483 = vmatpush1.bf16.msra.mxu0 %v1598_v51 }
 0x67d   :  { %1460 = vmatmul.mubr.bf16.vlgmr.msra.gmra.mxu1 %v2402_v63  ;;  %1501 = vmatmul.mubr.bf16.vlgmr.msra.gmra.mxu0 %v2402_v63 }
 0x71d   :  { %v1379_v1 = vpop.f32.mrf.mxu1  ;;  %v1420_v2 = vpop.f32.mrf.mxu0 }
 0x71e   :  { %v1380_v3 = vadd.f32 %v1379_v1, %v988_v59  ;;  %v1421_v4 = vadd.f32 %v1420_v2, %v996_v60 }
 0x71f   :  { %v1381_v5 = vpop.f32.mrf.mxu1  ;;  %v1422_v63 = vpop.f32.mrf.mxu0 }
 0x720   :  { %1509 = vst [vmem:[#allocation17] sm:$0xff] %v1380_v3  ;;  %1511 = vst [vmem:[#allocation17 + $0x10] sm:$0xff] %v1421_v4  ;;  %v1382_v6 = vadd.f32 %v1381_v5, %v992_v61  ;;  %v1423_v26 = vadd.f32 %v1422_v63, %v1000_v62 }
 0x721   :  { %v1383_v7 = vpop.f32.mrf.mxu1  ;;  %v1424_v8 = vpop.f32.mrf.mxu0 }
 0x722   :  { %1510 = vst [vmem:[#allocation17 + $0x8] sm:$0xff] %v1382_v6  ;;  %1512 = vst [vmem:[#allocation17 + $0x18] sm:$0xff] %v1423_v26 }
 0x723   :  { %v1384_v10 = vpop.f32.mrf.mxu1  ;;  %v1425_v11 = vpop.f32.mrf.mxu0 }
 0x73d   :  { %v1461_v20 = vpop.f32.mrf.mxu1  ;;  %v1502_v21 = vpop.f32.mrf.mxu0 }
 0x73e   :  { %v1462_v22 = vadd.f32 %v1461_v20, %v1004_v16  ;;  %v1503_v23 = vadd.f32 %v1502_v21, %v1012_v17 }
 0x73f   :  { %v1463_v24 = vpop.f32.mrf.mxu1  ;;  %v1504_v25 = vpop.f32.mrf.mxu0 }
 0x740   :  { %1513 = vst [vmem:[#allocation17 + $0x20] sm:$0xff] %v1462_v22  ;;  %1515 = vst [vmem:[#allocation17 + $0x30] sm:$0xff] %v1503_v23  ;;  %v1464_v9 = vadd.f32 %v1463_v24, %v1008_v18  ;;  %v1505_v27 = vadd.f32 %v1504_v25, %v1016_v19 }
 0x741   :  { %v1465_v28 = vpop.f32.mrf.mxu1  ;;  %v1506_v29 = vpop.f32.mrf.mxu0 }
 0x742   :  { %1514 = vst [vmem:[#allocation17 + $0x28] sm:$0xff] %v1464_v9  ;;  %1516 = vst [vmem:[#allocation17 + $0x38] sm:$0xff] %v1505_v27 }
 0x743   :  { %v1466_v30 = vpop.f32.mrf.mxu1  ;;  %v1507_v31 = vpop.f32.mrf.mxu0 }
 0x744   :  { %2112 = shalt.err (!%p2109_p7)
}
 0x745   :  { %1526 = dma.vmem_to_hbm [thread:$0]  %s1524_s0, 1024, %s2439_s17, [#allocation4]  }
 0x746   :  { %2131 = dma.done.wait [#allocation4], 1024  }
 0x747   :  { %2132 = vsyncadd [#allocation4], 4294966272 }
 0x748   :  { %1530 = vsyncpa [#allocation3], 1 }
 0x749   :  { %1531 = vsyncpa [#allocation6], 1 }
 0x74a   :  { %1532 = vsyncpa [#allocation9], 1 }
 0x74b   :  { %1533 = vsyncpa [#allocation12], 1 }
 0x74c   :  { %1534 = vsyncpa [#allocation15], 1 }
 0x74d   :  { %1535 = vsyncpa [#allocation4], 1 }

</bundles_post_ra>
